<compile_context>
chip_gen: v7x
topology: tpu7x:2x2x1
jax: 0.10.0
libtpu: 0.0.40
codegen_flags: <defaults>
</compile_context>

<pallas_src>
import numpy as np
import jax
import jax.numpy as jnp
from jax.experimental import pallas as pl
from jax.experimental.pallas import tpu as pltpu


# ------------------------------- fused kernel ------------------------------- #

def _make_fused_kernel(bb):
    """bb = batch entries handled per grid step (static: 1 or B)."""
    def kernel(lsf_ref, mf_ref, ef_ref, eprf_ref, of_ref, w_ref, b_ref, kt_ref,
               obj_ref, epr_ref, mup_ref, eup_ref):
        w = w_ref[...]        # (ND, N)  1x1-conv weight, resident across grid
        bias = b_ref[...]     # (ND, 1)
        kt = kt_ref[...]      # (HW, UP) kron(bilinear_rows, bilinear_cols)^T
        for b in range(bb):   # tiny static unroll (1 or 2 trips)
            lsf = lsf_ref[b]  # (N, D)

            # mask / edge / epr logits: three small MXU dots, stay in registers
            pm = jnp.dot(lsf, mf_ref[b], preferred_element_type=jnp.float32)   # (N, HW)
            pe = jnp.dot(lsf, ef_ref[b], preferred_element_type=jnp.float32)   # (N, HW)
            pp = jnp.dot(lsf, eprf_ref[b], preferred_element_type=jnp.float32) # (N, HW)

            # pred_obj: (N,D)*(1,D) multiply + lane reduce -> (N, 1)
            obj_ref[b] = jnp.sum(lsf * of_ref[b], axis=-1, keepdims=True)

            # epr_expand (1x1 conv) in (ND, HW) orientation: no transpose anywhere
            epr_ref[b] = jnp.dot(w, pp, preferred_element_type=jnp.float32) + bias

            # bilinear upsample: one lane-dense dot per stream (no concat)
            mup_ref[b] = jnp.dot(pm, kt, preferred_element_type=jnp.float32)   # (N, UP)
            eup_ref[b] = jnp.dot(pe, kt, preferred_element_type=jnp.float32)   # (N, UP)
    return kernel


# --------------------- bilinear interpolation matrices ---------------------- #

def bilinear_matrix(in_size, out_size):
    """Row-interpolation matrix replicating F.interpolate(mode='bilinear',
    align_corners=False) along one axis. Returns np.float32 (out, in)."""
    scale = in_size / out_size
    dst = np.arange(out_size, dtype=np.float64)
    src = (dst + 0.5) * scale - 0.5
    src = np.clip(src, 0.0, None)            # PyTorch clamps negative src to 0
    i0 = np.floor(src).astype(np.int64)
    i0 = np.minimum(i0, in_size - 1)
    i1 = np.minimum(i0 + 1, in_size - 1)
    frac = src - i0
    m = np.zeros((out_size, in_size), dtype=np.float32)
    rows = np.arange(out_size)
    np.add.at(m, (rows, i0), (1.0 - frac).astype(np.float32))
    np.add.at(m, (rows, i1), frac.astype(np.float32))
    return m


def _is_single_tensorcore_chip():
    """True for 1-TC chips (v5e/v6e): fold the batch into one grid step there."""
    try:
        kind = jax.devices()[0].device_kind.lower()
    except Exception:
        return False
    return any(t in kind for t in
               ("v5e", "v5 lite", "v5lite", "v6e", "v6 lite", "v6lite"))


# ------------------------------- full forward -------------------------------- #

def question2answer_forward(params, lsf, mf, ef, of, eprf, scale_factor):
    B, D, H, W = mf.shape
    N = lsf.shape[1]
    HW = H * W
    H2, W2 = H * scale_factor, W * scale_factor
    UP = H2 * W2
    ND = N * D

    # free reshapes (element order preserved, no copies/transposes)
    mf_f = mf.reshape(B, D, HW)
    ef_f = ef.reshape(B, D, HW)
    eprf_f = eprf.reshape(B, D, HW)
    of_row = of.reshape(B, 1, D)              # (B,D,1) -> (B,1,D): same ordering

    w = params["epr_w"]                        # (ND, N), untransposed
    b_col = params["epr_b"].reshape(ND, 1)     # (ND, 1)

    a_mat = bilinear_matrix(H, H2)             # (H2, H)
    b_mat = bilinear_matrix(W, W2)             # (W2, W)
    kt = jnp.asarray(np.kron(a_mat, b_mat).T)  # (HW, UP) separable -> single matmul

    bb = B if _is_single_tensorcore_chip() else 1
    grid = (B // bb,)
    kernel = _make_fused_kernel(bb)

    obj, epr, mup, eup = pl.pallas_call(
        kernel,
        out_shape=(
            jax.ShapeDtypeStruct((B, N, 1), jnp.float32),     # pred_obj
            jax.ShapeDtypeStruct((B, ND, HW), jnp.float32),   # epr (reshape only)
            jax.ShapeDtypeStruct((B, N, UP), jnp.float32),    # upsampled masks
            jax.ShapeDtypeStruct((B, N, UP), jnp.float32),    # upsampled edges
        ),
        grid=grid,
        in_specs=[
            pl.BlockSpec((bb, N, D), lambda i: (i, 0, 0)),
            pl.BlockSpec((bb, D, HW), lambda i: (i, 0, 0)),
            pl.BlockSpec((bb, D, HW), lambda i: (i, 0, 0)),
            pl.BlockSpec((bb, D, HW), lambda i: (i, 0, 0)),
            pl.BlockSpec((bb, 1, D), lambda i: (i, 0, 0)),
            pl.BlockSpec((ND, N), lambda i: (0, 0)),
            pl.BlockSpec((ND, 1), lambda i: (0, 0)),
            pl.BlockSpec((HW, UP), lambda i: (0, 0)),
        ],
        out_specs=(
            pl.BlockSpec((bb, N, 1), lambda i: (i, 0, 0)),
            pl.BlockSpec((bb, ND, HW), lambda i: (i, 0, 0)),
            pl.BlockSpec((bb, N, UP), lambda i: (i, 0, 0)),
            pl.BlockSpec((bb, N, UP), lambda i: (i, 0, 0)),
        ),
        compiler_params=pltpu.CompilerParams(
            dimension_semantics=("parallel",)),
    )(lsf, mf_f, ef_f, eprf_f, of_row, w, b_col, kt)

    return {
        "pred_masks": mup.reshape(B, N, H2, W2),
        "pred_edges": eup.reshape(B, N, H2, W2),
        "pred_eprs": epr.reshape(B, N, D, H, W),   # pure reshape, no transpose
        "pred_obj": obj,
    }


# ----------------------------- pure-JAX reference ---------------------------- #

def reference_forward(params, lsf, mf, ef, of, eprf, scale_factor):
    B, D, H, W = mf.shape
    N = lsf.shape[1]
    H2, W2 = H * scale_factor, W * scale_factor
    pm = jnp.einsum("bnd,bdx->bnx", lsf, mf.reshape(B, D, -1)).reshape(B, N, H, W)
    pe = jnp.einsum("bnd,bdx->bnx", lsf, ef.reshape(B, D, -1)).reshape(B, N, H, W)
    pp = jnp.einsum("bnd,bdx->bnx", lsf, eprf.reshape(B, D, -1))
    po = jnp.einsum("bnd,bdo->bno", lsf, of)
    ppe = (jnp.einsum("on,bnx->box", params["epr_w"], pp)
           + params["epr_b"][None, :, None])
    ppe = ppe.reshape(B, N, D, H, W)
    a_mat = jnp.asarray(bilinear_matrix(H, H2))
    bt_mat = jnp.asarray(bilinear_matrix(W, W2)).T
    up = lambda x: jnp.einsum("ph,bnhw,wq->bnpq", a_mat, x, bt_mat)
    return {"pred_masks": up(pm), "pred_edges": up(pe),
            "pred_eprs": ppe, "pred_obj": po}


# ----------------------------------- main ------------------------------------ #

if __name__ == "__main__":
    # cfg: NUM_MASKS=8, HIDDEN_DIM=16 (so D = 32), SCALE_FACTOR=2
    B, N, HIDDEN, H, W = 2, 8, 16, 8, 8
    D = HIDDEN * 2
    SCALE = 2

    key = jax.random.PRNGKey(0)
    k_lsf, k_mf, k_ef, k_of, k_eprf, k_w = jax.random.split(key, 6)

    lsf = jax.random.normal(k_lsf, (B, N, D), dtype=jnp.float32)
    mf = jax.random.normal(k_mf, (B, D, H, W), dtype=jnp.float32)
    ef = jax.random.normal(k_ef, (B, D, H, W), dtype=jnp.float32)
    of = jax.random.normal(k_of, (B, D, 1), dtype=jnp.float32)
    eprf = jax.random.normal(k_eprf, (B, D, H, W), dtype=jnp.float32)

    # epr_expand = Conv2d(N, N*D, 1): kaiming_normal_(fan_out, relu), bias = 0
    ND = N * D
    fan_out = ND * 1 * 1
    std = float(np.sqrt(2.0 / fan_out))
    epr_w = jax.random.normal(k_w, (ND, N), dtype=jnp.float32) * std
    epr_b = jnp.zeros((ND,), dtype=jnp.float32)
    params = {"epr_w": epr_w, "epr_b": epr_b}

    out = question2answer_forward(params, lsf, mf, ef, of, eprf, SCALE)
    out = jax.tree_util.tree_map(jax.block_until_ready, out)

    ref = reference_forward(params, lsf, mf, ef, of, eprf, SCALE)
    for name in ("pred_masks", "pred_edges", "pred_eprs", "pred_obj"):
        assert out[name].shape == ref[name].shape, (name, out[name].shape)
        np.testing.assert_allclose(np.asarray(out[name]), np.asarray(ref[name]),
                                   rtol=1e-5, atol=1e-5)

    assert out["pred_masks"].shape == (B, N, H * SCALE, W * SCALE)
    assert out["pred_edges"].shape == (B, N, H * SCALE, W * SCALE)
    assert out["pred_eprs"].shape == (B, N, D, H, W)
    assert out["pred_obj"].shape == (B, N, 1)

    print("KERNEL_OK")
</pallas_src>

<mosaic_0001>
module attributes {stable_mosaic.version = 11 : i64} {
  func.func @kernel(%arg0: i32, %arg1: memref<1x8x32xf32, #tpu.memory_space<vmem>>, %arg2: memref<1x32x64xf32, #tpu.memory_space<vmem>>, %arg3: memref<1x32x64xf32, #tpu.memory_space<vmem>>, %arg4: memref<1x32x64xf32, #tpu.memory_space<vmem>>, %arg5: memref<1x1x32xf32, #tpu.memory_space<vmem>>, %arg6: memref<256x8xf32, #tpu.memory_space<vmem>>, %arg7: memref<256x1xf32, #tpu.memory_space<vmem>>, %arg8: memref<64x256xf32, #tpu.memory_space<vmem>>, %arg9: memref<1x8x1xf32, #tpu.memory_space<vmem>>, %arg10: memref<1x256x64xf32, #tpu.memory_space<vmem>>, %arg11: memref<1x8x256xf32, #tpu.memory_space<vmem>>, %arg12: memref<1x8x256xf32, #tpu.memory_space<vmem>>) attributes {dimension_semantics = [#tpu.dimension_semantics<parallel>], iteration_bounds = array<i64: 2>, scalar_prefetch = 0 : i64, scratch_operands = 0 : i64, tpu.core_type = #tpu.core_type<tc>, window_params = [{transform_indices = @transform_0, window_bounds = array<i64: 1, 8, 32>}, {transform_indices = @transform_1, window_bounds = array<i64: 1, 32, 64>}, {transform_indices = @transform_2, window_bounds = array<i64: 1, 32, 64>}, {transform_indices = @transform_3, window_bounds = array<i64: 1, 32, 64>}, {transform_indices = @transform_4, window_bounds = array<i64: 1, 1, 32>}, {pipeline_mode = #tpu.pipeline_mode<synchronous>, transform_indices = @transform_5, window_bounds = array<i64: 256, 8>}, {pipeline_mode = #tpu.pipeline_mode<synchronous>, transform_indices = @transform_6, window_bounds = array<i64: 256, 1>}, {pipeline_mode = #tpu.pipeline_mode<synchronous>, transform_indices = @transform_7, window_bounds = array<i64: 64, 256>}, {transform_indices = @transform_8, window_bounds = array<i64: 1, 8, 1>}, {transform_indices = @transform_9, window_bounds = array<i64: 1, 256, 64>}, {transform_indices = @transform_10, window_bounds = array<i64: 1, 8, 256>}, {transform_indices = @transform_11, window_bounds = array<i64: 1, 8, 256>}]} {
    %c0 = arith.constant 0 : index
    %c0_0 = arith.constant 0 : index
    %0 = vector.load %arg6[%c0, %c0_0] : memref<256x8xf32, #tpu.memory_space<vmem>>, vector<256x8xf32>
    %c0_1 = arith.constant 0 : index
    %c0_2 = arith.constant 0 : index
    %1 = vector.load %arg7[%c0_1, %c0_2] : memref<256x1xf32, #tpu.memory_space<vmem>>, vector<256x1xf32>
    %c0_3 = arith.constant 0 : index
    %c0_4 = arith.constant 0 : index
    %2 = vector.load %arg8[%c0_3, %c0_4] : memref<64x256xf32, #tpu.memory_space<vmem>>, vector<64x256xf32>
    %c0_5 = arith.constant 0 : index
    %c0_6 = arith.constant 0 : index
    %c0_7 = arith.constant 0 : index
    %3 = vector.load %arg1[%c0_5, %c0_6, %c0_7] : memref<1x8x32xf32, #tpu.memory_space<vmem>>, vector<1x8x32xf32>
    %4 = vector.shape_cast %3 : vector<1x8x32xf32> to vector<8x32xf32>
    %c0_8 = arith.constant 0 : index
    %c0_9 = arith.constant 0 : index
    %c0_10 = arith.constant 0 : index
    %5 = vector.load %arg2[%c0_8, %c0_9, %c0_10] : memref<1x32x64xf32, #tpu.memory_space<vmem>>, vector<1x32x64xf32>
    %6 = vector.shape_cast %5 : vector<1x32x64xf32> to vector<32x64xf32>
    %cst = arith.constant dense<0.000000e+00> : vector<8x64xf32>
    %7 = tpu.matmul %4, %6, %cst {dimension_numbers = #tpu.dot_dimension_numbers<[1], [0], [0], [1], [0, 0, 1, 1], [], []>} : vector<8x32xf32>, vector<32x64xf32>, vector<8x64xf32> -> vector<8x64xf32>
    %c0_11 = arith.constant 0 : index
    %c0_12 = arith.constant 0 : index
    %c0_13 = arith.constant 0 : index
    %8 = vector.load %arg3[%c0_11, %c0_12, %c0_13] : memref<1x32x64xf32, #tpu.memory_space<vmem>>, vector<1x32x64xf32>
    %9 = vector.shape_cast %8 : vector<1x32x64xf32> to vector<32x64xf32>
    %cst_14 = arith.constant dense<0.000000e+00> : vector<8x64xf32>
    %10 = tpu.matmul %4, %9, %cst_14 {dimension_numbers = #tpu.dot_dimension_numbers<[1], [0], [0], [1], [0, 0, 1, 1], [], []>} : vector<8x32xf32>, vector<32x64xf32>, vector<8x64xf32> -> vector<8x64xf32>
    %c0_15 = arith.constant 0 : index
    %c0_16 = arith.constant 0 : index
    %c0_17 = arith.constant 0 : index
    %11 = vector.load %arg4[%c0_15, %c0_16, %c0_17] : memref<1x32x64xf32, #tpu.memory_space<vmem>>, vector<1x32x64xf32>
    %12 = vector.shape_cast %11 : vector<1x32x64xf32> to vector<32x64xf32>
    %cst_18 = arith.constant dense<0.000000e+00> : vector<8x64xf32>
    %13 = tpu.matmul %4, %12, %cst_18 {dimension_numbers = #tpu.dot_dimension_numbers<[1], [0], [0], [1], [0, 0, 1, 1], [], []>} : vector<8x32xf32>, vector<32x64xf32>, vector<8x64xf32> -> vector<8x64xf32>
    %c0_19 = arith.constant 0 : index
    %c0_20 = arith.constant 0 : index
    %c0_21 = arith.constant 0 : index
    %14 = vector.load %arg5[%c0_19, %c0_20, %c0_21] : memref<1x1x32xf32, #tpu.memory_space<vmem>>, vector<1x1x32xf32>
    %15 = vector.shape_cast %14 : vector<1x1x32xf32> to vector<1x32xf32>
    %16 = vector.broadcast %15 : vector<1x32xf32> to vector<8x32xf32>
    %17 = arith.mulf %4, %16 : vector<8x32xf32>
    %cst_22 = arith.constant dense<0.000000e+00> : vector<8xf32>
    %18 = vector.multi_reduction <add>, %17, %cst_22 [1] : vector<8x32xf32> to vector<8xf32>
    %19 = vector.shape_cast %18 : vector<8xf32> to vector<8x1xf32>
    %c0_23 = arith.constant 0 : index
    %c0_24 = arith.constant 0 : index
    %c0_25 = arith.constant 0 : index
    %20 = vector.load %arg9[%c0_23, %c0_24, %c0_25] : memref<1x8x1xf32, #tpu.memory_space<vmem>>, vector<1x8x1xf32>
    %21 = vector.shape_cast %20 : vector<1x8x1xf32> to vector<8x1xf32>
    %22 = vector.shape_cast %19 : vector<8x1xf32> to vector<1x8x1xf32>
    tpu.vector_store %arg9[%c0_23, %c0_24, %c0_25], %22 {strides = array<i32>} : memref<1x8x1xf32, #tpu.memory_space<vmem>>, vector<1x8x1xf32>,
    %cst_26 = arith.constant dense<0.000000e+00> : vector<256x64xf32>
    %23 = tpu.matmul %0, %13, %cst_26 {dimension_numbers = #tpu.dot_dimension_numbers<[1], [0], [0], [1], [0, 0, 1, 1], [], []>} : vector<256x8xf32>, vector<8x64xf32>, vector<256x64xf32> -> vector<256x64xf32>
    %24 = vector.broadcast %1 : vector<256x1xf32> to vector<256x64xf32>
    %25 = arith.addf %23, %24 : vector<256x64xf32>
    %c0_27 = arith.constant 0 : index
    %c0_28 = arith.constant 0 : index
    %c0_29 = arith.constant 0 : index
    %26 = vector.load %arg10[%c0_27, %c0_28, %c0_29] : memref<1x256x64xf32, #tpu.memory_space<vmem>>, vector<1x256x64xf32>
    %27 = vector.shape_cast %26 : vector<1x256x64xf32> to vector<256x64xf32>
    %28 = vector.shape_cast %25 : vector<256x64xf32> to vector<1x256x64xf32>
    tpu.vector_store %arg10[%c0_27, %c0_28, %c0_29], %28 {strides = array<i32>} : memref<1x256x64xf32, #tpu.memory_space<vmem>>, vector<1x256x64xf32>,
    %cst_30 = arith.constant dense<0.000000e+00> : vector<8x256xf32>
    %29 = tpu.matmul %7, %2, %cst_30 {dimension_numbers = #tpu.dot_dimension_numbers<[1], [0], [0], [1], [0, 0, 1, 1], [], []>} : vector<8x64xf32>, vector<64x256xf32>, vector<8x256xf32> -> vector<8x256xf32>
    %c0_31 = arith.constant 0 : index
    %c0_32 = arith.constant 0 : index
    %c0_33 = arith.constant 0 : index
    %30 = vector.load %arg11[%c0_31, %c0_32, %c0_33] : memref<1x8x256xf32, #tpu.memory_space<vmem>>, vector<1x8x256xf32>
    %31 = vector.shape_cast %30 : vector<1x8x256xf32> to vector<8x256xf32>
    %32 = vector.shape_cast %29 : vector<8x256xf32> to vector<1x8x256xf32>
    tpu.vector_store %arg11[%c0_31, %c0_32, %c0_33], %32 {strides = array<i32>} : memref<1x8x256xf32, #tpu.memory_space<vmem>>, vector<1x8x256xf32>,
    %cst_34 = arith.constant dense<0.000000e+00> : vector<8x256xf32>
    %33 = tpu.matmul %10, %2, %cst_34 {dimension_numbers = #tpu.dot_dimension_numbers<[1], [0], [0], [1], [0, 0, 1, 1], [], []>} : vector<8x64xf32>, vector<64x256xf32>, vector<8x256xf32> -> vector<8x256xf32>
    %c0_35 = arith.constant 0 : index
    %c0_36 = arith.constant 0 : index
    %c0_37 = arith.constant 0 : index
    %34 = vector.load %arg12[%c0_35, %c0_36, %c0_37] : memref<1x8x256xf32, #tpu.memory_space<vmem>>, vector<1x8x256xf32>
    %35 = vector.shape_cast %34 : vector<1x8x256xf32> to vector<8x256xf32>
    %36 = vector.shape_cast %33 : vector<8x256xf32> to vector<1x8x256xf32>
    tpu.vector_store %arg12[%c0_35, %c0_36, %c0_37], %36 {strides = array<i32>} : memref<1x8x256xf32, #tpu.memory_space<vmem>>, vector<1x8x256xf32>,
    return
  }
  func.func @transform_0(%arg0: i32) -> (i32, i32, i32) {
    %c0_i32 = arith.constant 0 : i32
    %c0_i32_0 = arith.constant 0 : i32
    %c0_i32_1 = arith.constant 0 : i32
    return %arg0, %c0_i32, %c0_i32_0 : i32, i32, i32
  }
  func.func @transform_1(%arg0: i32) -> (i32, i32, i32) {
    %c0_i32 = arith.constant 0 : i32
    %c0_i32_0 = arith.constant 0 : i32
    %c0_i32_1 = arith.constant 0 : i32
    return %arg0, %c0_i32, %c0_i32_0 : i32, i32, i32
  }
  func.func @transform_2(%arg0: i32) -> (i32, i32, i32) {
    %c0_i32 = arith.constant 0 : i32
    %c0_i32_0 = arith.constant 0 : i32
    %c0_i32_1 = arith.constant 0 : i32
    return %arg0, %c0_i32, %c0_i32_0 : i32, i32, i32
  }
  func.func @transform_3(%arg0: i32) -> (i32, i32, i32) {
    %c0_i32 = arith.constant 0 : i32
    %c0_i32_0 = arith.constant 0 : i32
    %c0_i32_1 = arith.constant 0 : i32
    return %arg0, %c0_i32, %c0_i32_0 : i32, i32, i32
  }
  func.func @transform_4(%arg0: i32) -> (i32, i32, i32) {
    %c0_i32 = arith.constant 0 : i32
    %c0_i32_0 = arith.constant 0 : i32
    %c0_i32_1 = arith.constant 0 : i32
    return %arg0, %c0_i32, %c0_i32_0 : i32, i32, i32
  }
  func.func @transform_5(%arg0: i32) -> (i32, i32) {
    %c0_i32 = arith.constant 0 : i32
    %c0_i32_0 = arith.constant 0 : i32
    %c0_i32_1 = arith.constant 0 : i32
    return %c0_i32, %c0_i32_0 : i32, i32
  }
  func.func @transform_6(%arg0: i32) -> (i32, i32) {
    %c0_i32 = arith.constant 0 : i32
    %c0_i32_0 = arith.constant 0 : i32
    %c0_i32_1 = arith.constant 0 : i32
    return %c0_i32, %c0_i32_0 : i32, i32
  }
  func.func @transform_7(%arg0: i32) -> (i32, i32) {
    %c0_i32 = arith.constant 0 : i32
    %c0_i32_0 = arith.constant 0 : i32
    %c0_i32_1 = arith.constant 0 : i32
    return %c0_i32, %c0_i32_0 : i32, i32
  }
  func.func @transform_8(%arg0: i32) -> (i32, i32, i32) {
    %c0_i32 = arith.constant 0 : i32
    %c0_i32_0 = arith.constant 0 : i32
    %c0_i32_1 = arith.constant 0 : i32
    return %arg0, %c0_i32, %c0_i32_0 : i32, i32, i32
  }
  func.func @transform_9(%arg0: i32) -> (i32, i32, i32) {
    %c0_i32 = arith.constant 0 : i32
    %c0_i32_0 = arith.constant 0 : i32
    %c0_i32_1 = arith.constant 0 : i32
    return %arg0, %c0_i32, %c0_i32_0 : i32, i32, i32
  }
  func.func @transform_10(%arg0: i32) -> (i32, i32, i32) {
    %c0_i32 = arith.constant 0 : i32
    %c0_i32_0 = arith.constant 0 : i32
    %c0_i32_1 = arith.constant 0 : i32
    return %arg0, %c0_i32, %c0_i32_0 : i32, i32, i32
  }
  func.func @transform_11(%arg0: i32) -> (i32, i32, i32) {
    %c0_i32 = arith.constant 0 : i32
    %c0_i32_0 = arith.constant 0 : i32
    %c0_i32_1 = arith.constant 0 : i32
    return %arg0, %c0_i32, %c0_i32_0 : i32, i32, i32
  }
}

</mosaic_0001>

<bundles_post_ra>
// kernel: tpu_custom_call.1
= control target key start
LH: loop header
LB: loop body
LE: loop exit
PB: predicated region body
PF: predicated region fallthrough
CT: control target
= control target key end

     0   :  { %s2725_s0 = inlined_call_operand.vmem [shape: f32[2,8,32], index: 0, kind: input, shape index: {}]   ;;  %s2726_s1 = inlined_call_operand.vmem [shape: f32[2,32,64], index: 1, kind: input, shape index: {}]   ;;  %s2727_s2 = inlined_call_operand.vmem [shape: f32[2,32,64], index: 2, kind: input, shape index: {}]   ;;  %s2728_s3 = inlined_call_operand.vmem [shape: f32[2,32,64], index: 3, kind: input, shape index: {}]   ;;  %s2729_s4 = inlined_call_operand.vmem [shape: f32[2,1,32], index: 4, kind: input, shape index: {}]   ;;  %s2730_s5 = inlined_call_operand.vmem [shape: f32[256,8], index: 5, kind: input, shape index: {}]   ;;  %s2731_s6 = inlined_call_operand.vmem [shape: f32[256,1], index: 6, kind: input, shape index: {}]   ;;  %s2732_s7 = inlined_call_operand.vmem [shape: f32[64,256], index: 7, kind: input, shape index: {}]   ;;  %s2733_s8 = inlined_call_operand.vmem [shape: f32[2,8,1], index: 8, kind: output, shape index: {0}]   ;;  %s2734_s9 = inlined_call_operand.vmem [shape: f32[2,256,64], index: 9, kind: output, shape index: {1}]   ;;  %s2735_s10 = inlined_call_operand.hbm [shape: f32[2,8,256], index: 10, kind: output, shape index: {2}]   ;;  %s2736_s11 = inlined_call_operand.hbm [shape: f32[2,8,256], index: 11, kind: output, shape index: {3}]  }
   0x1   :  { %2740 = sst [smem:[#allocation9_spill]] %s2725_s0 }
   0x2   :  { %2741 = sst [smem:[#allocation10_spill]] %s2726_s1 }
   0x3   :  { %17 = vsyncpa [#allocation3], 0 }
   0x4   :  { %19 = vsyncpa [#allocation3 + $0x1], 0 }
   0x5   :  { %20 = vsyncpa [#allocation5], 0 }
   0x6   :  { %22 = vsyncpa [#allocation5 + $0x1], 0  ;;  %s2173_s17 = smov 0   ;;  %s2175_s18 = smov 0  }
   0x7   :  { %s2177_s19 = smov 0   ;;  %s2179_s20 = smov 0  }
   0x8 LB: > { %s2194_s21 = sadd.s32 4294967295, %s2105_s20   ;;  %s1710_s22 = sadd.s32 4294967294, %s2105_s20   ;;  %s2105_s20 = sphi %s2179_s20, %s2754_s20   ;;  %s2101_s19 = sphi %s2177_s19, %s2753_s19   ;;  %s2097_s18 = sphi %s2175_s18, %s2752_s18   ;;  %s2093_s17 = sphi %s2173_s17, %s2751_s17  }
   0x9   : > { %s2198_s23 = sadd.s32 1, %s2105_s20   ;;  %s280_s24 = sadd.s32 1, %s2101_s19 }
   0xa   : > { %s277_s25 = ssub.s32 %s2105_s20, %s2198_s23  ;;  %p290_p0 = scmp.ne.s32.totalorder %s2101_s19, %s2097_s18 }
   0xb   : > { %p278_p1 = scmp.eq.s32.totalorder %s277_s25, 0  ;;  %p291_p2 = scmp.eq.s32.totalorder %s2194_s21, 1 }
   0xc   : > { %p296_p3 = scmp.ne.s32.totalorder %s2097_s18, %s2093_s17  ;;  %p297_p4 = scmp.eq.s32.totalorder %s1710_s22, 1 }
   0xd   : > { %s2209_s26 = scalar_select %p278_p1, %s2101_s19, %s280_s24  }
   0xe   : > { %p2211_p5 = por %p291_p2, %p290_p0  ;;  %p2215_p6 = por %p297_p4, %p296_p3 }
   0xf   : > { %2742 = sst [smem:[#allocation8_spill]] %s2209_s26  ;;  %p1713_p7 = scmp.ge.s32.totalorder %s2105_s20, 1 }
  0x10   : > { %p387_p8 = scmp.lt.s32.totalorder %s2105_s20, 3 }
  0x12   : > { %p388_p9 = pnand %p1713_p7, %p387_p8 }
  0x13   : > { %p458_p10 = scmp.lt.s32.totalorder (!%p388_p9), %s2194_s21, 1  ;;  %v2107_v0 = vmov (!%p388_p9), 0.0|0.0   ;;  %vm2108_vm0 = vmmov (!%p388_p9), 0   ;;  %v2109_v1 = vmov (!%p388_p9), 0.0   ;;  %v522_v2 = vld [vmem:[%s2731_s6 + $0x8] sm:$0xff] (!%p388_p9)  ;;  %v2110_v3 = vmov (!%p388_p9), 0  }
  0x14   : > { %391 = sbr.rel (%p388_p9) target bundleno = 541 (0x21d), region = 52  ;;  %1909 = vmatprep.subr.bf16.mxu0 (!%p388_p9), %v2107_v0  ;;  %1834 = vmatprep.mubr.msk.f32.mxu0 (!%p388_p9), %vm2108_vm0, %v2109_v1  ;;  %s2745_s1 = sld [smem:[#allocation10_spill]] (!%p388_p9)  ;;  %v523_v4 = vld [vmem:[%s2731_s6 + $0x10] sm:$0xff] (!%p388_p9)  ;;  %v524_v10 = vld [vmem:[%s2731_s6 + $0x18] sm:$0xff] (!%p388_p9)  ;;  %vm574_vm1 = vcmask (!%p388_p9), 261120   ;;  %v525_v24 = vld [vmem:[%s2731_s6 + $0x20] sm:$0xff] (!%p388_p9) }
  0x15   : > { %1915 = vmatprep.subr.bf16.mxu1 (!%p388_p9), %v2107_v0  ;;  %1845 = vmatprep.mubr.msk.f32.mxu1 (!%p388_p9), %vm2108_vm0, %v2109_v1  ;;  %s2746_s0 = sld [smem:[#allocation9_spill]] (!%p388_p9)  ;;  %v526_v26 = vld [vmem:[%s2731_s6 + $0x28] sm:$0xff] (!%p388_p9)  ;;  %v527_v27 = vld [vmem:[%s2731_s6 + $0x30] sm:$0xff] (!%p388_p9)  ;;  %v528_v28 = vld [vmem:[%s2731_s6 + $0x38] sm:$0xff] (!%p388_p9)  ;;  %vm969_vm2 = vcmask (!%p388_p9), 64512   ;;  %vm1291_vm3 = vcmask (!%p388_p9), 523264  }
  0x16   : > { %2010 = vset.pattern.permute.xlu1 (!%p388_p9), %v2110_v3  ;;  %2009 = vset.pattern.permute.xlu0 (!%p388_p9), %v2110_v3  ;;  %v529_v29 = vld [vmem:[%s2731_s6 + $0x40] sm:$0xff] (!%p388_p9)  ;;  %v530_v32 = vld [vmem:[%s2731_s6 + $0x48] sm:$0xff] (!%p388_p9)  ;;  %v531_v33 = vld [vmem:[%s2731_s6 + $0x50] sm:$0xff] (!%p388_p9)  ;;  %vm807_vm4 = vcmask (!%p388_p9), 7168   ;;  %s2738_s24 = sshll.u32 (!%p388_p9), %s2194_s21, 8 }
  0x17   : > { %816 = vperm.xlu1 (!%p388_p9), %2010, %v522_v2   ;;  %v489_v30 = vld [vmem:[%s2730_s5] sm:$0xff] (!%p388_p9)  ;;  %v532_v34 = vld [vmem:[%s2731_s6 + $0x58] sm:$0xff] (!%p388_p9)  ;;  %v535_v36 = vld [vmem:[%s2731_s6 + $0x70] sm:$0xff] (!%p388_p9) }
  0x18   : > { %v497_v31 = vld [vmem:[%s2730_s5 + $0x40] sm:$0xff] (!%p388_p9)  ;;  %v539_v39 = vld [vmem:[%s2731_s6 + $0x90] sm:$0xff] (!%p388_p9)  ;;  %v534_v49 = vld [vmem:[%s2731_s6 + $0x68] sm:$0xff] (!%p388_p9) }
  0x19   : > { %v533_v35 = vld [vmem:[%s2731_s6 + $0x60] sm:$0xff] (!%p388_p9)  ;;  %v543_v43 = vld [vmem:[%s2731_s6 + $0xb0] sm:$0xff] (!%p388_p9)  ;;  %v536_v50 = vld [vmem:[%s2731_s6 + $0x78] sm:$0xff] (!%p388_p9) }
  0x1a   : > { %v537_v37 = vld [vmem:[%s2731_s6 + $0x80] sm:$0xff] (!%p388_p9)  ;;  %v547_v45 = vld [vmem:[%s2731_s6 + $0xd0] sm:$0xff] (!%p388_p9)  ;;  %v538_v51 = vld [vmem:[%s2731_s6 + $0x88] sm:$0xff] (!%p388_p9) }
  0x1b   : > { %s2228_s12 = scalar_select %p458_p10, %s2194_s21, 1  ;;  %821 = vperm.xlu1 %2010, %v523_v4   ;;  %v541_v42 = vld [vmem:[%s2731_s6 + $0xa0] sm:$0xff]  ;;  %v551_v47 = vld [vmem:[%s2731_s6 + $0xf0] sm:$0xff]  ;;  %v540_v52 = vld [vmem:[%s2731_s6 + $0x98] sm:$0xff] }
  0x1c   : > { %v545_v44 = vld [vmem:[%s2731_s6 + $0xc0] sm:$0xff]  ;;  %v542_v53 = vld [vmem:[%s2731_s6 + $0xa8] sm:$0xff]  ;;  %v544_v54 = vld [vmem:[%s2731_s6 + $0xb8] sm:$0xff] }
  0x1d   : > { %s1772_s13 = sshll.u32 %s2228_s12, 5  ;;  %s2737_s26 = sshll.u32 %s2228_s12, 3  ;;  %v549_v46 = vld [vmem:[%s2731_s6 + $0xe0] sm:$0xff]  ;;  %v546_v55 = vld [vmem:[%s2731_s6 + $0xc8] sm:$0xff]  ;;  %v548_v56 = vld [vmem:[%s2731_s6 + $0xd8] sm:$0xff] }
  0x1e   : > { %s466_s16 = scalar_lea.vmem %s2745_s1, %s1772_s13  ;;  %s2242_s30 = scalar_lea.vmem %s2728_s3, %s1772_s13  ;;  %v521_v48 = vld [vmem:[%s2731_s6] sm:$0xff]  ;;  %v550_v57 = vld [vmem:[%s2731_s6 + $0xe8] sm:$0xff]  ;;  %v552_v58 = vld [vmem:[%s2731_s6 + $0xf8] sm:$0xff] }
  0x1f   : > { %v570_v5 = vld [vmem:[%s466_s16] sm:$0xff]  ;;  %v571_v6 = vld [vmem:[%s466_s16 + $0x8] sm:$0xff]  ;;  %v572_v7 = vld [vmem:[%s466_s16 + $0x10] sm:$0xff]  ;;  %s471_s1 = scalar_lea.vmem %s2727_s2, %s1772_s13  ;;  %s461_s29 = scalar_lea.vmem %s2746_s0, %s2737_s26  ;;  %826 = vperm.xlu1 %2010, %v524_v10  }
  0x20   : > { %v1910_v8 = vpack.c.bf16 %v571_v6, %v570_v5  ;;  %v573_v9 = vld [vmem:[%s466_s16 + $0x18] sm:$0xff]  ;;  %v648_v12 = vld [vmem:[%s471_s1] sm:$0xff]  ;;  %v649_v13 = vld [vmem:[%s471_s1 + $0x8] sm:$0xff]  ;;  %s479_s16 = scalar_lea.vmem %s2729_s4, %s2228_s12  ;;  %s2747_s0 = sshll.u32 %s2228_s12, 3 }
  0x21   : > { %v1913_v11 = vpack.c.bf16 %v573_v9, %v572_v7  ;;  %v650_v14 = vld [vmem:[%s471_s1 + $0x10] sm:$0xff]  ;;  %v722_v15 = vld [vmem:[%s2242_s30] sm:$0xff]  ;;  %v723_v16 = vld [vmem:[%s2242_s30 + $0x8] sm:$0xff]  ;;  %v1916_v17 = vpack.c.bf16 %v649_v13, %v648_v12  ;;  %s1775_s14 = sshll.u32 %s2228_s12, 8  ;;  %s2573_s12 = sand.u32 1, %s2097_s18  }
  0x22   : > { %1911 = vmatpush3.bf16.msra.mxu0 %v1910_v8  ;;  %v651_v18 = vld [vmem:[%s471_s1 + $0x18] sm:$0xff]  ;;  %v569_v20 = vld [vmem:[%s461_s29] sm:$0xff]  ;;  %v1922_v21 = vpack.c.bf16 %v723_v16, %v722_v15  ;;  %v724_v22 = vld [vmem:[%s2242_s30 + $0x10] sm:$0xff]  ;;  %s2739_s22 = sshll.u32 %s2573_s12, 4  ;;  %s2615_s29 = scalar_lea.hbm %s2735_s10, %s2738_s24 }
  0x23   : > { %1912 = vmatprep.subr.bf16.mxu0 %v2107_v0  ;;  %1917 = vmatpush3.bf16.msra.mxu1 %v1916_v17  ;;  %v1919_v19 = vpack.c.bf16 %v651_v18, %v650_v14  ;;  %v725_v23 = vld [vmem:[%s2242_s30 + $0x18] sm:$0xff]  ;;  %v1729_v38 = vld [vmem:[%s479_s16] ss:$0 sm:$0xff]  ;;  %v554_v63 = vld [vmem:[%s2732_s7 + $0x8] sm:$0xff]  ;;  %s483_s16 = scalar_lea.vmem %s2733_s8, %s2747_s0  ;;  %s2560_s30 = scalar_lea.vmem %s2734_s9, %s1775_s14 }
  0x24   : > { %1918 = vmatprep.subr.bf16.mxu1 %v2107_v0  ;;  %v1925_v25 = vpack.c.bf16 %v725_v23, %v724_v22  ;;  %831 = vperm.xlu1 %2010, %v525_v24   ;;  %v803_v40 = vmul.f32 %v1729_v38, %v569_v20  ;;  %v553_v2 = vld [vmem:[%s2732_s7] sm:$0xff]  ;;  %v555_v3 = vld [vmem:[%s2732_s7 + $0x10] sm:$0xff]  ;;  %v558_v4 = vld [vmem:[%s2732_s7 + $0x28] sm:$0xff]  ;;  %s450_s26 = scalar_lea.vmem [#allocation2], %s2739_s22  ;;  %s1486_s13 = scalar_lea.sflag [#allocation3], %s2573_s12 }
  0x25   : > { %v560_v5 = vld [vmem:[%s2732_s7 + $0x38] sm:$0xff]  ;;  %v490_v7 = vld [vmem:[%s2730_s5 + $0x8] sm:$0xff]  ;;  %v491_v12 = vld [vmem:[%s2730_s5 + $0x10] sm:$0xff]  ;;  %s1511_s0 = sshll.u32 %s450_s26, 4  ;;  %s2111_s1 = smov [#allocation2]   ;;  %s2608_s0 = int_to_ptr.vmem [resolvable:$true] %s1511_s0 }
  0x26   : > { %1914 = vmatpush3.bf16.msra.mxu0 %v1913_v11  ;;  %v804_v41 = vsel %vm574_vm1, %v803_v40, 0.0  ;;  %v498_v8 = vld [vmem:[%s2730_s5 + $0x48] sm:$0xff]  ;;  %v2393_v11 = vpack.c.bf16 %v555_v3, %v553_v2  ;;  %v499_v13 = vld [vmem:[%s2730_s5 + $0x50] sm:$0xff]  ;;  %v1931_v14 = vpack.c.bf16 %v560_v5, %v558_v4  ;;  %v557_v15 = vld [vmem:[%s2732_s7 + $0x20] sm:$0xff]  ;;  %s2011_s14 = scalar_lea.vmem %s2608_s0, 256  ;;  %s2015_s15 = sshll.u32 %s2111_s1, 4  ;;  %s2016_s15 = int_to_ptr.vmem [resolvable:$false] %s2015_s15 }
  0x27   : > { %1921 = vmatprep.subr.bf16.mxu0 %v2107_v0  ;;  %1920 = vmatpush3.bf16.msra.mxu1 %v1919_v19  ;;  %v559_v16 = vld [vmem:[%s2732_s7 + $0x30] sm:$0xff]  ;;  %v562_v17 = vld [vmem:[%s2732_s7 + $0x48] sm:$0xff]  ;;  %v564_v18 = vld [vmem:[%s2732_s7 + $0x58] sm:$0xff]  ;;  %p2012_p11 = scmp.ne.s32.totalorder %s2608_s0, %s2011_s14  ;;  %s2017_s25 = scalar_lea.vmem %s2016_s15, 512 }
  0x28   : > { %836 = vperm.xlu1 %2010, %v526_v26   ;;  %805 = vadd.xlane.f32.xlu0 %v804_v41  ;;  %v492_v19 = vld [vmem:[%s2730_s5 + $0x18] sm:$0xff]  ;;  %v493_v22 = vld [vmem:[%s2730_s5 + $0x20] sm:$0xff]  ;;  %v1935_v24 = vpack.c.bf16 %v564_v18, %v562_v17  ;;  %v563_v26 = vld [vmem:[%s2732_s7 + $0x50] sm:$0xff]  ;;  %p2018_p0 = scmp.lt.s32.totalorder %s2608_s0, %s2016_s15  ;;  %p2019_p1 = scmp.lt.s32.totalorder %s2017_s25, %s2011_s14 }
  0x29   : > { %1835 = vmatmul.mubr.msk.f32.vlgmr.msra.gmra.mrb[0].mxu0 %vm574_vm1, %v569_v20  ;;  %v501_v23 = vld [vmem:[%s2730_s5 + $0x60] sm:$0xff]  ;;  %v504_v38 = vld [vmem:[%s2730_s5 + $0x78] sm:$0xff]  ;;  %v506_v41 = vld [vmem:[%s2730_s5 + $0x88] sm:$0xff]  ;;  %p2013_p12 = pnand %p2012_p11, %p2211_p5 }
  0x2a   : > { %1923 = vmatpush3.bf16.msra.mxu0 %v1922_v21  ;;  %1856 = vmatprep.mubr.msk.f32.mxu0 %vm2108_vm0, %v2109_v1  ;;  %v1933_v21 = vpack.c.bf16 %v559_v16, %v557_v15  ;;  %v505_v40 = vld [vmem:[%s2730_s5 + $0x80] sm:$0xff]  ;;  %p2020_p2 = por %p2019_p1, %p2018_p0 }
  0x2b   : > { %1924 = vmatprep.subr.bf16.mxu0 %v2107_v0  ;;  %1846 = vmatmul.mubr.msk.f32.vlgmr.msra.gmra.mrb[0].mxu1 %vm574_vm1, %v569_v20  ;;  %v556_v0 = vld [vmem:[%s2732_s7 + $0x18] sm:$0xff]  ;;  %p2014_p13 = pneg %p2013_p12 }
  0x2c   : > { %841 = vperm.xlu1 %2010, %v527_v27   ;;  %1873 = vmatprep.mubr.msk.f32.mxu1 %vm969_vm2, %v497_v31  ;;  %v1927_v9 = vpack.c.bf16 %v556_v0, %v554_v63  ;;  %v566_v27 = vld [vmem:[%s2732_s7 + $0x68] sm:$0xff] }
  0x2d   : > { %p2021_p3 = pnand %p2020_p2, %p2014_p13 }
  0x2e   : > { %1926 = vmatpush3.bf16.msra.mxu0 %v1925_v25  ;;  %v561_v25 = vld [vmem:[%s2732_s7 + $0x40] sm:$0xff] }
  0x2f   : > { %v1937_v31 = vpack.c.bf16 %v563_v26, %v561_v25 }
  0x30   : > { %846 = vperm.xlu1 %2010, %v528_v28   ;;  %v568_v28 = vld [vmem:[%s2732_s7 + $0x78] sm:$0xff] }
  0x31   : > { %1857 = vmatmul.mubr.msk.f32.vlgmr.msra.gmra.mrb[2].mxu0 %vm574_vm1, %v569_v20  ;;  %v500_v20 = vld [vmem:[%s2730_s5 + $0x58] sm:$0xff] }
  0x32   : > { %1861 = vmatprep.mubr.msk.f32.mxu0 %vm969_vm2, %v489_v30  ;;  %v502_v30 = vld [vmem:[%s2730_s5 + $0x68] sm:$0xff] }
  0x34   : > { %851 = vperm.xlu1 %2010, %v529_v29   ;;  %v494_v29 = vld [vmem:[%s2730_s5 + $0x28] sm:$0xff] }
  0x38   : > { %856 = vperm.xlu1 %2010, %v530_v32   ;;  %v495_v32 = vld [vmem:[%s2730_s5 + $0x30] sm:$0xff] }
  0x3c   : > { %861 = vperm.xlu1 %2010, %v531_v33   ;;  %v503_v33 = vld [vmem:[%s2730_s5 + $0x70] sm:$0xff] }
  0x3e   : > { %811 = vperm.xlu0 %2009, %v521_v48   ;;  %v514_v48 = vld [vmem:[%s2730_s5 + $0xc8] sm:$0xff] }
  0x40   : > { %866 = vperm.xlu1 %2010, %v532_v34   ;;  %v1939_v34 = vpack.c.bf16 %v568_v28, %v566_v27 }
  0x42   : > { %876 = vperm.xlu0 %2009, %v534_v49   ;;  %v515_v49 = vld [vmem:[%s2730_s5 + $0xd0] sm:$0xff] }
  0x44   : > { %871 = vperm.xlu1 %2010, %v533_v35   ;;  %v565_v35 = vld [vmem:[%s2732_s7 + $0x60] sm:$0xff] }
  0x46   : > { %886 = vperm.xlu0 %2009, %v536_v50   ;;  %v516_v50 = vld [vmem:[%s2730_s5 + $0xd8] sm:$0xff] }
  0x48   : > { %881 = vperm.xlu1 %2010, %v535_v36   ;;  %v567_v36 = vld [vmem:[%s2732_s7 + $0x70] sm:$0xff] }
  0x4a   : > { %896 = vperm.xlu0 %2009, %v538_v51   ;;  %v517_v51 = vld [vmem:[%s2730_s5 + $0xe0] sm:$0xff] }
  0x4c   : > { %891 = vperm.xlu1 %2010, %v537_v37   ;;  %v496_v37 = vld [vmem:[%s2730_s5 + $0x38] sm:$0xff] }
  0x4e   : > { %906 = vperm.xlu0 %2009, %v540_v52   ;;  %v518_v52 = vld [vmem:[%s2730_s5 + $0xe8] sm:$0xff] }
  0x50   : > { %901 = vperm.xlu1 %2010, %v539_v39   ;;  %v1941_v39 = vpack.c.bf16 %v567_v36, %v565_v35 }
  0x52   : > { %916 = vperm.xlu0 %2009, %v542_v53   ;;  %v519_v53 = vld [vmem:[%s2730_s5 + $0xf0] sm:$0xff] }
  0x54   : > { %911 = vperm.xlu1 %2010, %v541_v42   ;;  %v507_v42 = vld [vmem:[%s2730_s5 + $0x90] sm:$0xff] }
  0x56   : > { %926 = vperm.xlu0 %2009, %v544_v54   ;;  %v520_v54 = vld [vmem:[%s2730_s5 + $0xf8] sm:$0xff] }
  0x58   : > { %921 = vperm.xlu1 %2010, %v543_v43   ;;  %v508_v43 = vld [vmem:[%s2730_s5 + $0x98] sm:$0xff] }
  0x5a   : > { %936 = vperm.xlu0 %2009, %v546_v55  }
  0x5c   : > { %931 = vperm.xlu1 %2010, %v545_v44   ;;  %v509_v44 = vld [vmem:[%s2730_s5 + $0xa0] sm:$0xff] }
  0x5e   : > { %946 = vperm.xlu0 %2009, %v548_v56  }
  0x60   : > { %941 = vperm.xlu1 %2010, %v547_v45   ;;  %v510_v45 = vld [vmem:[%s2730_s5 + $0xa8] sm:$0xff] }
  0x62   : > { %956 = vperm.xlu0 %2009, %v550_v57  }
  0x64   : > { %951 = vperm.xlu1 %2010, %v549_v46   ;;  %v511_v46 = vld [vmem:[%s2730_s5 + $0xb0] sm:$0xff] }
  0x66   : > { %966 = vperm.xlu0 %2009, %v552_v58  }
  0x68   : > { %961 = vperm.xlu1 %2010, %v551_v47   ;;  %v513_v47 = vld [vmem:[%s2730_s5 + $0xc0] sm:$0xff] }
  0x96   : > { %v817_v56 = vpop.permute.xlu1 %816 }
  0x9a   : > { %v822_v57 = vpop.permute.xlu1 %821 }
  0x9e   : > { %v827_v58 = vpop.permute.xlu1 %826 }
  0xb5   : > { %v806_v55 = vpop.xlane.xlu0 %805 }
  0xb6   : > { %808 = vst.msk [vmem:[%s483_s16] sm:$0xff] %vm807_vm4, %v806_v55 }
  0xbd   : > { %v812_v4 = vpop.permute.xlu0 %811 }
  0xfc   : > { %v2365_v59 = vpop.f32.mrb[0].mxu0 }
  0xfd   : > { %v1836_v60 = vpop.f32.mrb[1].mxu0 }
  0xfe   : > { %v2367_v61 = vpop.f32.mrb[0].mxu1 }
  0xff   : > { %v1847_v62 = vpop.f32.mrb[1].mxu1 }
 0x104   : > { %v792_v6 = vpop.f32.mrb[2].mxu0 }
 0x105   : > { %v1858_v10 = vpop.f32.mrb[3].mxu0  ;;  %1859 = vmatprep.subr.mxu0 %v792_v6  ;;  %1959 = vmatprep.subr.mxu1 %v792_v6 }
 0x106   : > { %1860 = vmatpush3.msra.mxu0 %v792_v6  ;;  %1960 = vmatpush3.msra.mxu1 %v792_v6  ;;  %v877_v6 = vpop.permute.xlu0 %876 }
 0x107   : > { %1862 = vmatmul.mubr.msk.f32.vlgmr.msra.gmra.mrb[4].mxu0 %vm969_vm2, %v490_v7  ;;  %1874 = vmatmul.mubr.msk.f32.vlgmr.msra.gmra.mrb[2].mxu1 %vm969_vm2, %v498_v8 }
 0x108   : > { %1928 = vmatprep.subr.bf16.mxu0 %v1927_v9  ;;  %1864 = vmatprep.mubr.msk.f32.mxu0 %vm969_vm2, %v491_v12 }
 0x109   : > { %1930 = vmatpush1.bf16.msra.mxu0 %v2393_v11  ;;  %1876 = vmatprep.mubr.msk.f32.mxu1 %vm969_vm2, %v499_v13 }
 0x10a   : > { %1932 = vmatprep.subr.bf16.mxu0 %v1931_v14  ;;  %v887_v8 = vpop.permute.xlu0 %886 }
 0x10b   : > { %1865 = vmatmul.mubr.msk.f32.gmra.mrb[6].mxu0 %vm969_vm2, %v492_v19  ;;  %1877 = vmatmul.mubr.msk.f32.gmra.mrb[4].mxu1 %vm969_vm2, %v500_v20 }
 0x10c   : > { %1867 = vmatprep.mubr.msk.f32.mxu0 %vm969_vm2, %v493_v22  ;;  %1879 = vmatprep.mubr.msk.f32.mxu1 %vm969_vm2, %v501_v23 }
 0x10d   : > { %1934 = vmatpush1.bf16.msra.mxu0 %v1933_v21 }
 0x10e   : > { %1936 = vmatprep.subr.bf16.mxu0 %v1935_v24  ;;  %v897_v10 = vpop.permute.xlu0 %896 }
 0x10f   : > { %1868 = vmatmul.mubr.msk.f32.gmra.mrb[8].mxu0 %vm969_vm2, %v494_v29  ;;  %1880 = vmatmul.mubr.msk.f32.gmra.mrb[6].mxu1 %vm969_vm2, %v502_v30 }
 0x110   : > { %1870 = vmatprep.mubr.msk.f32.mxu0 %vm969_vm2, %v495_v32  ;;  %1882 = vmatprep.mubr.msk.f32.mxu1 %vm969_vm2, %v503_v33 }
 0x111   : > { %1938 = vmatpush1.bf16.msra.mxu0 %v1937_v31 }
 0x112   : > { %1940 = vmatprep.subr.bf16.mxu0 %v1939_v34  ;;  %v2575_v28 = vpop.permute.xlu0 %906 }
 0x113   : > { %1871 = vmatmul.mubr.msk.f32.gmra.mrb[10].mxu0 %vm969_vm2, %v496_v37  ;;  %1883 = vmatmul.mubr.msk.f32.gmra.mrb[8].mxu1 %vm969_vm2, %v504_v38 }
 0x114   : > { %1885 = vmatprep.mubr.msk.f32.mxu1 %vm969_vm2, %v505_v40  ;;  %1391 = vmatprep.mubr.f32.mxu0 %v2109_v1 }
 0x115   : > { %1942 = vmatpush1.bf16.msra.mxu0 %v1941_v39 }
 0x116   : > { %1944 = vmatprep.subr.bf16.mxu0 %v1927_v9 }
 0x117   : > { %1886 = vmatmul.mubr.msk.f32.gmra.mrb[10].mxu1 %vm969_vm2, %v506_v41 }
 0x118   : > { %1762 = vmatmul.mubr.msk.f32.vlgmr.msra.gmra.mrb[12].mxu0 %vm1291_vm3, %v2365_v59  ;;  %1888 = vmatprep.mubr.msk.f32.mxu1 %vm969_vm2, %v507_v42  ;;  %v832_v59 = vpop.permute.xlu1 %831 }
 0x119   : > { %1946 = vmatpush1.bf16.msra.mxu0 %v2393_v11  ;;  %1467 = vmatprep.mubr.f32.mxu0 %v2109_v1  ;;  %v512_v1 = vld [vmem:[%s2730_s5 + $0xb8] sm:$0xff] }
 0x11a   : > { %1948 = vmatprep.subr.bf16.mxu0 %v1931_v14 }
 0x11b   : > { %1889 = vmatmul.mubr.msk.f32.gmra.mrb[12].mxu1 %vm969_vm2, %v508_v43 }
 0x11c   : > { %1891 = vmatprep.mubr.msk.f32.mxu1 %vm969_vm2, %v509_v44  ;;  %v837_v60 = vpop.permute.xlu1 %836  ;;  %v917_v44 = vpop.permute.xlu0 %916 }
 0x11d   : > { %1950 = vmatpush1.bf16.msra.mxu0 %v1933_v21 }
 0x11e   : > { %1952 = vmatprep.subr.bf16.mxu0 %v1935_v24 }
 0x11f   : > { %1892 = vmatmul.mubr.msk.f32.gmra.mrb[14].mxu1 %vm969_vm2, %v510_v45 }
 0x120   : > { %1894 = vmatprep.mubr.msk.f32.mxu1 %vm969_vm2, %v511_v46 }
 0x121   : > { %1954 = vmatpush1.bf16.msra.mxu0 %v1937_v31 }
 0x122   : > { %1956 = vmatprep.subr.bf16.mxu0 %v1939_v34 }
 0x123   : > { %1895 = vmatmul.mubr.msk.f32.gmra.mrb[16].mxu1 %vm969_vm2, %v512_v1 }
 0x124   : > { %1897 = vmatprep.mubr.msk.f32.mxu1 %vm969_vm2, %v513_v47 }
 0x125   : > { %1958 = vmatpush1.bf16.msra.mxu0 %v1941_v39 }
 0x127   : > { %1898 = vmatmul.mubr.msk.f32.gmra.mrb[18].mxu1 %vm969_vm2, %v514_v48 }
 0x128   : > { %1900 = vmatprep.mubr.msk.f32.mxu1 %vm969_vm2, %v515_v49  ;;  %1763 = vmatmul.mubr.msk.f32.vlgmr.msra.gmra.mrb[14].mxu0 %vm1291_vm3, %v2367_v61  ;;  %v2552_v61 = vpop.permute.xlu1 %841 }
 0x12b   : > { %1901 = vmatmul.mubr.msk.f32.gmra.mrb[20].mxu1 %vm969_vm2, %v516_v50 }
 0x12c   : > { %1903 = vmatprep.mubr.msk.f32.mxu1 %vm969_vm2, %v517_v51  ;;  %v847_v62 = vpop.permute.xlu1 %846 }
 0x12f   : > { %1904 = vmatmul.mubr.msk.f32.gmra.mrb[22].mxu1 %vm969_vm2, %v518_v52 }
 0x130   : > { %1906 = vmatprep.mubr.msk.f32.mxu1 %vm969_vm2, %v519_v53  ;;  %v852_v63 = vpop.permute.xlu1 %851  ;;  %v927_v53 = vpop.permute.xlu0 %926 }
 0x133   : > { %1907 = vmatmul.mubr.msk.f32.gmra.mrb[24].mxu1 %vm969_vm2, %v520_v54 }
 0x134   : > { %v857_v0 = vpop.permute.xlu1 %856 }
 0x138   : > { %v862_v2 = vpop.permute.xlu1 %861 }
 0x13c   : > { %v867_v3 = vpop.permute.xlu1 %866 }
 0x140   : > { %v872_v5 = vpop.permute.xlu1 %871 }
 0x144   : > { %v882_v7 = vpop.permute.xlu1 %881 }
 0x148   : > { %v2555_v9 = vpop.permute.xlu1 %891 }
 0x14c   : > { %v2562_v19 = vpop.permute.xlu1 %901 }
 0x150   : > { %v2586_v37 = vpop.permute.xlu1 %911 }
 0x154   : > { %v922_v52 = vpop.permute.xlu1 %921 }
 0x1da   : > { %v1863_v11 = vpop.f32.mrb[4].mxu0  ;;  %v1875_v12 = vpop.f32.mrb[2].mxu1 }
 0x1db   : > { %v1138_v13 = vadd.f32 %v1863_v11, %v817_v56  ;;  %v1178_v14 = vadd.f32 %v1875_v12, %v857_v0  ;;  %v1172_v15 = vpop.f32.mrb[3].mxu1  ;;  %v1132_v16 = vpop.f32.mrb[5].mxu0 }
 0x1dc   : > { %v1173_v17 = vadd.f32 %v1172_v15, %v852_v63  ;;  %v1133_v18 = vadd.f32 %v1132_v16, %v812_v4 }
 0x1dd   : > { %1293 = vst.msk [vmem:[%s2560_s30 + $0x8] sm:$0xff] %vm1291_vm3, %v1138_v13  ;;  %1301 = vst.msk [vmem:[%s2560_s30 + $0x48] sm:$0xff] %vm1291_vm3, %v1178_v14 }
 0x1de   : > { %1300 = vst.msk [vmem:[%s2560_s30 + $0x40] sm:$0xff] %vm1291_vm3, %v1173_v17  ;;  %1292 = vst.msk [vmem:[%s2560_s30] sm:$0xff] %vm1291_vm3, %v1133_v18  ;;  %v1866_v20 = vpop.f32.mrb[6].mxu0  ;;  %v1878_v21 = vpop.f32.mrb[4].mxu1 }
 0x1df   : > { %v1148_v22 = vadd.f32 %v1866_v20, %v827_v58  ;;  %v1188_v23 = vadd.f32 %v1878_v21, %v867_v3  ;;  %v1142_v24 = vpop.f32.mrb[7].mxu0  ;;  %v1182_v25 = vpop.f32.mrb[5].mxu1 }
 0x1e0   : > { %v1143_v26 = vadd.f32 %v1142_v24, %v822_v57  ;;  %v1183_v27 = vadd.f32 %v1182_v25, %v862_v2 }
 0x1e1   : > { %1295 = vst.msk [vmem:[%s2560_s30 + $0x18] sm:$0xff] %vm1291_vm3, %v1148_v22  ;;  %1303 = vst.msk [vmem:[%s2560_s30 + $0x58] sm:$0xff] %vm1291_vm3, %v1188_v23 }
 0x1e2   : > { %1294 = vst.msk [vmem:[%s2560_s30 + $0x10] sm:$0xff] %vm1291_vm3, %v1143_v26  ;;  %1302 = vst.msk [vmem:[%s2560_s30 + $0x50] sm:$0xff] %vm1291_vm3, %v1183_v27  ;;  %v1869_v29 = vpop.f32.mrb[8].mxu0  ;;  %v1881_v30 = vpop.f32.mrb[6].mxu1 }
 0x1e3   : > { %v1158_v31 = vadd.f32 %v1869_v29, %v837_v60  ;;  %v1198_v32 = vadd.f32 %v1881_v30, %v877_v6  ;;  %v1152_v33 = vpop.f32.mrb[9].mxu0  ;;  %v1192_v34 = vpop.f32.mrb[7].mxu1 }
 0x1e4   : > { %v1153_v35 = vadd.f32 %v1152_v33, %v832_v59  ;;  %v1193_v36 = vadd.f32 %v1192_v34, %v872_v5 }
 0x1e5   : > { %1297 = vst.msk [vmem:[%s2560_s30 + $0x28] sm:$0xff] %vm1291_vm3, %v1158_v31  ;;  %1305 = vst.msk [vmem:[%s2560_s30 + $0x68] sm:$0xff] %vm1291_vm3, %v1198_v32 }
 0x1e6   : > { %1296 = vst.msk [vmem:[%s2560_s30 + $0x20] sm:$0xff] %vm1291_vm3, %v1153_v35  ;;  %1304 = vst.msk [vmem:[%s2560_s30 + $0x60] sm:$0xff] %vm1291_vm3, %v1193_v36  ;;  %v1872_v38 = vpop.f32.mrb[10].mxu0  ;;  %v1884_v39 = vpop.f32.mrb[8].mxu1 }
 0x1e7   : > { %v1168_v40 = vadd.f32 %v1872_v38, %v847_v62  ;;  %v1208_v41 = vadd.f32 %v1884_v39, %v887_v8  ;;  %v1162_v42 = vpop.f32.mrb[11].mxu0  ;;  %v1202_v43 = vpop.f32.mrb[9].mxu1 }
 0x1e8   : > { %v1163_v45 = vadd.f32 %v1162_v42, %v2552_v61  ;;  %v1203_v46 = vadd.f32 %v1202_v43, %v882_v7 }
 0x1e9   : > { %1299 = vst.msk [vmem:[%s2560_s30 + $0x38] sm:$0xff] %vm1291_vm3, %v1168_v40  ;;  %1307 = vst.msk [vmem:[%s2560_s30 + $0x78] sm:$0xff] %vm1291_vm3, %v1208_v41 }
 0x1ea   : > { %1298 = vst.msk [vmem:[%s2560_s30 + $0x30] sm:$0xff] %vm1291_vm3, %v1163_v45  ;;  %1306 = vst.msk [vmem:[%s2560_s30 + $0x70] sm:$0xff] %vm1291_vm3, %v1203_v46  ;;  %v1887_v1 = vpop.f32.mrb[10].mxu1 }
 0x1eb   : > { %v1218_v47 = vadd.f32 %v1887_v1, %v897_v10  ;;  %v1393_v48 = vpop.f32.mrb[12].mxu0  ;;  %v1212_v49 = vpop.f32.mrb[11].mxu1 }
 0x1ec   : > { %1398 = vst [vmem:[%s450_s26] sm:$0xff] %v1393_v48  ;;  %v1213_v50 = vadd.f32 %v1212_v49, %v2555_v9  ;;  %v1395_v51 = vpop.f32.mrb[13].mxu0 }
 0x1ed   : > { %1309 = vst.msk [vmem:[%s2560_s30 + $0x88] sm:$0xff] %vm1291_vm3, %v1218_v47  ;;  %1399 = vst [vmem:[%s450_s26 + $0x8] sm:$0xff] %v1395_v51 }
 0x1ee   : > { %1308 = vst.msk [vmem:[%s2560_s30 + $0x80] sm:$0xff] %vm1291_vm3, %v1213_v50  ;;  %v1890_v54 = vpop.f32.mrb[12].mxu1 }
 0x1ef   : > { %2024 = shalt.err (!%p2021_p3)
}
 0x1f0   : > { %s2025_s26 = scalar_lea.hbm %s2615_s29, 256  ;;  %s2029_s1 = scalar_lea.hbm %s2735_s10, 512 }
 0x1f1   : > { %p2026_p4 = scmp.ne.s32.totalorder %s2615_s29, %s2025_s26  ;;  %p2030_p9 = scmp.lt.u32.totalorder %s2615_s29, %s2735_s10 }
 0x1f2   : > { %p2031_p10 = scmp.lt.u32.totalorder %s2029_s1, %s2025_s26  ;;  %p2033_p12 = scmp.lt.u32.totalorder %s2025_s26, %s2615_s29 }
 0x1f3   : > { %p2027_p7 = pnand %p2026_p4, %p2211_p5 }
 0x1f4   : > { %p2032_p11 = por %p2031_p10, %p2030_p9 }
 0x1f5   : > { %p2028_p8 = pneg %p2027_p7 }
 0x1f6   : > { %p2034_p13 = por %p2033_p12, %p2032_p11 }
 0x1f8   : > { %p2035_p0 = pnand %p2034_p13, %p2028_p8 }
 0x1fa   : > { %2038 = shalt.err (!%p2035_p0)
}
 0x1fb   : > { %1961 = dma.vmem_to_hbm [thread:$0]  (%p2211_p5), %s2608_s0, 256, %s2615_s29, %s1486_s13   ;;  %v1228_v55 = vadd.f32 %v1890_v54, %v2575_v28  ;;  %v1222_v56 = vpop.f32.mrb[13].mxu1  ;;  %v932_v59 = vpop.permute.xlu1 %931 }
 0x1fc   : > { %v1223_v57 = vadd.f32 %v1222_v56, %v2562_v19  ;;  %v1893_v58 = vpop.f32.mrb[14].mxu1  ;;  %v937_v62 = vpop.permute.xlu0 %936  ;;  %s2748_s22 = sshll.u32 %s2573_s12, 4  ;;  %s2749_s29 = sshll.u32 %s2194_s21, 8 }
 0x1fd   : > { %1311 = vst.msk [vmem:[%s2560_s30 + $0x98] sm:$0xff] %vm1291_vm3, %v1228_v55  ;;  %v1238_v60 = vadd.f32 %v1893_v58, %v917_v44  ;;  %v1232_v61 = vpop.f32.mrb[15].mxu1  ;;  %s457_s0 = scalar_lea.vmem [#allocation4], %s2748_s22  ;;  %v1469_v10 = vpop.f32.mrb[14].mxu0  ;;  %s2668_s25 = scalar_lea.hbm %s2736_s11, %s2749_s29 }
 0x1fe   : > { %1310 = vst.msk [vmem:[%s2560_s30 + $0x90] sm:$0xff] %vm1291_vm3, %v1223_v57  ;;  %v1233_v63 = vadd.f32 %v1232_v61, %v2586_v37  ;;  %v1896_v0 = vpop.f32.mrb[16].mxu1  ;;  %s1525_s24 = sshll.u32 %s457_s0, 4  ;;  %1474 = vst [vmem:[%s457_s0] sm:$0xff] %v1469_v10  ;;  %v1471_v12 = vpop.f32.mrb[15].mxu0  ;;  %s1491_s26 = scalar_lea.sflag [#allocation5], %s2573_s12  ;;  %s2661_s24 = int_to_ptr.vmem [resolvable:$true] %s1525_s24 }
 0x1ff   : > { %1313 = vst.msk [vmem:[%s2560_s30 + $0xa8] sm:$0xff] %vm1291_vm3, %v1238_v60  ;;  %v1248_v2 = vadd.f32 %v1896_v0, %v927_v53  ;;  %v1242_v3 = vpop.f32.mrb[17].mxu1  ;;  %v942_v5 = vpop.permute.xlu1 %941  ;;  %1475 = vst [vmem:[%s457_s0 + $0x8] sm:$0xff] %v1471_v12  ;;  %s2039_s16 = scalar_lea.vmem %s2661_s24, 256  ;;  %s2112_s21 = smov [#allocation4]  }
 0x200   : > { %1312 = vst.msk [vmem:[%s2560_s30 + $0xa0] sm:$0xff] %vm1291_vm3, %v1233_v63  ;;  %v1243_v4 = vadd.f32 %v1242_v3, %v922_v52  ;;  %v947_v6 = vpop.permute.xlu0 %946  ;;  %v1899_v7 = vpop.f32.mrb[18].mxu1  ;;  %p2040_p1 = scmp.ne.s32.totalorder %s2661_s24, %s2039_s16  ;;  %s2043_s1 = sshll.u32 %s2112_s21, 4  ;;  %s2044_s1 = int_to_ptr.vmem [resolvable:$false] %s2043_s1 }
 0x201   : > { %1315 = vst.msk [vmem:[%s2560_s30 + $0xb8] sm:$0xff] %vm1291_vm3, %v1248_v2  ;;  %v1258_v8 = vadd.f32 %v1899_v7, %v937_v62  ;;  %v1252_v9 = vpop.f32.mrb[19].mxu1  ;;  %s2045_s15 = scalar_lea.vmem %s2044_s1, 512  ;;  %p2046_p4 = scmp.lt.s32.totalorder %s2661_s24, %s2044_s1 }
 0x202   : > { %1314 = vst.msk [vmem:[%s2560_s30 + $0xb0] sm:$0xff] %vm1291_vm3, %v1243_v4  ;;  %v1253_v11 = vadd.f32 %v1252_v9, %v932_v59  ;;  %v1902_v13 = vpop.f32.mrb[20].mxu1  ;;  %p2041_p2 = pnand %p2040_p1, %p2211_p5  ;;  %p2047_p7 = scmp.lt.s32.totalorder %s2045_s15, %s2039_s16 }
 0x203   : > { %1317 = vst.msk [vmem:[%s2560_s30 + $0xc8] sm:$0xff] %vm1291_vm3, %v1258_v8 }
 0x204   : > { %1316 = vst.msk [vmem:[%s2560_s30 + $0xc0] sm:$0xff] %vm1291_vm3, %v1253_v11  ;;  %p2042_p3 = pneg %p2041_p2  ;;  %p2048_p8 = por %p2047_p7, %p2046_p4 }
 0x206   : > { %p2049_p9 = pnand %p2048_p8, %p2042_p3 }
 0x208   : > { %2052 = shalt.err (!%p2049_p9)
}
 0x209   : > { %s2053_s12 = scalar_lea.hbm %s2668_s25, 256  ;;  %s2057_s29 = scalar_lea.hbm %s2736_s11, 512 }
 0x20a   : > { %p2054_p10 = scmp.ne.s32.totalorder %s2668_s25, %s2053_s12  ;;  %p2058_p13 = scmp.lt.u32.totalorder %s2668_s25, %s2736_s11 }
 0x20b   : > { %p2059_p0 = scmp.lt.u32.totalorder %s2057_s29, %s2053_s12  ;;  %p2061_p2 = scmp.lt.u32.totalorder %s2053_s12, %s2668_s25 }
 0x20c   : > { %p2055_p11 = pnand %p2054_p10, %p2211_p5 }
 0x20d   : > { %p2060_p1 = por %p2059_p0, %p2058_p13 }
 0x20e   : > { %p2056_p12 = pneg %p2055_p11 }
 0x20f   : > { %p2062_p3 = por %p2061_p2, %p2060_p1 }
 0x211   : > { %p2063_p4 = pnand %p2062_p3, %p2056_p12 }
 0x213   : > { %2066 = shalt.err (!%p2063_p4)
}
 0x214   : > { %1962 = dma.vmem_to_hbm [thread:$0]  (%p2211_p5), %s2661_s24, 256, %s2668_s25, %s1491_s26   ;;  %v1268_v14 = vadd.f32 %v1902_v13, %v947_v6  ;;  %v1262_v15 = vpop.f32.mrb[21].mxu1  ;;  %v957_v16 = vpop.permute.xlu0 %956 }
 0x215   : > { %v1263_v17 = vadd.f32 %v1262_v15, %v942_v5  ;;  %v952_v18 = vpop.permute.xlu1 %951  ;;  %v1905_v19 = vpop.f32.mrb[22].mxu1 }
 0x216   : > { %1319 = vst.msk [vmem:[%s2560_s30 + $0xd8] sm:$0xff] %vm1291_vm3, %v1268_v14  ;;  %v1278_v20 = vadd.f32 %v1905_v19, %v957_v16  ;;  %v1272_v21 = vpop.f32.mrb[23].mxu1 }
 0x217   : > { %1318 = vst.msk [vmem:[%s2560_s30 + $0xd0] sm:$0xff] %vm1291_vm3, %v1263_v17  ;;  %v1273_v22 = vadd.f32 %v1272_v21, %v952_v18  ;;  %v1908_v24 = vpop.f32.mrb[24].mxu1 }
 0x218   : > { %1321 = vst.msk [vmem:[%s2560_s30 + $0xe8] sm:$0xff] %vm1291_vm3, %v1278_v20  ;;  %v967_v23 = vpop.permute.xlu0 %966  ;;  %v1282_v27 = vpop.f32.mrb[25].mxu1 }
 0x219   : > { %1320 = vst.msk [vmem:[%s2560_s30 + $0xe0] sm:$0xff] %vm1291_vm3, %v1273_v22  ;;  %v962_v25 = vpop.permute.xlu1 %961  ;;  %v1288_v26 = vadd.f32 %v1908_v24, %v967_v23 }
 0x21a   : > { %v1283_v28 = vadd.f32 %v1282_v27, %v962_v25 }
 0x21b   : > { %1323 = vst.msk [vmem:[%s2560_s30 + $0xf8] sm:$0xff] %vm1291_vm3, %v1288_v26 }
 0x21c   : > { %1322 = vst.msk [vmem:[%s2560_s30 + $0xf0] sm:$0xff] %vm1291_vm3, %v1283_v28 }
 0x21d PF: > { %p1972_p5 = scmp.ge.s32.totalorder %s2105_s20, 2  ;;  %s1552_s27 = sand.u32 1, %s2093_s17  }
 0x21e   : > { %s1553_s24 = scalar_lea.sflag [#allocation3], %s1552_s27 }
 0x21f   : > { %p1966_p7 = pnand %p1972_p5, %p2215_p6 }
 0x221   : > { %2084 = dma.done.wait (!%p1966_p7), %s1553_s24, 256  }
 0x222   : > { %2086 = vsyncadd (!%p1966_p7), %s1553_s24, 4294967040  ;;  %s1562_s25 = scalar_lea.sflag [#allocation5], %s1552_s27 }
 0x223   : > { %2088 = dma.done.wait (!%p1966_p7), %s1562_s25, 256  }
 0x224   : > { %2090 = vsyncadd (!%p1966_p7), %s1562_s25, 4294967040  ;;  %s2750_s26 = sld [smem:[#allocation8_spill]]  ;;  %p25_p8 = scmp.ge.s32.totalorder %s2198_s23, 4  }
 0x225   : > { %s2751_s17 = smov %s2097_s18  ;;  %s2752_s18 = smov %s2101_s19 }
 0x226   : > { %s2754_s20 = smov %s2198_s23  ;;  %27 = sbr.rel (!%p25_p8) target bundleno = 8 (0x8), region = 140 }
 0x22a   : > { %s2753_s19 = smov %s2750_s26 }
 0x22d   :  { %1567 = vsyncpa [#allocation3], 1 }
 0x22e   :  { %1569 = vsyncpa [#allocation3 + $0x1], 1 }
 0x22f   :  { %1570 = vsyncpa [#allocation5], 1 }
 0x230   :  { %1572 = vsyncpa [#allocation5 + $0x1], 1 }

</bundles_post_ra>
